<compile_context>
chip_gen: v7x
topology: tpu7x:2x2x1
jax: 0.10.0
libtpu: 0.0.40
codegen_flags: <defaults>
</compile_context>

<pallas_src>
import math

import jax
import jax.numpy as jnp
from jax.experimental import pallas as pl
from jax.experimental.pallas import tpu as pltpu


# ---------------------------------------------------------------------------
# Pallas kernel: single fused GEMM   y = x @ W_comb + b_comb
# ---------------------------------------------------------------------------
def _classifier_kernel(x_ref, w_ref, b_ref, out_ref):
    y = jnp.dot(x_ref[...], w_ref[...], preferred_element_type=jnp.float32)
    out_ref[...] = (y + b_ref[...]).astype(out_ref.dtype)


# ---------------------------------------------------------------------------
# Offline weight fold — call ONCE, outside the per-forward path.
# ---------------------------------------------------------------------------
def fold_params(params, *, compute_dtype=jnp.bfloat16):
    """Fold value-proj -> out-proj -> fc into one (E, C) weight + (1, C) bias."""
    E = params["out_proj_w"].shape[0]
    f32 = jnp.float32
    wv = params["in_proj_w"][2 * E:3 * E].astype(f32)      # value-projection slice (E, E)
    bv = params["in_proj_b"][2 * E:3 * E].astype(f32)      # (E,)
    wo = params["out_proj_w"].astype(f32)
    bo = params["out_proj_b"].astype(f32)
    wfc = params["fc_w"].astype(f32)
    bfc = params["fc_b"].astype(f32)
    w_comb = wv.T @ wo.T @ wfc.T                            # (E, C), folded in f32
    b_comb = ((bv @ wo.T + bo) @ wfc.T + bfc)[None]         # (1, C), kept f32
    return w_comb.astype(compute_dtype), b_comb


# ---------------------------------------------------------------------------
# Pallas forward (row-tiled over logits; folded weights resident in VMEM).
# ---------------------------------------------------------------------------
def classifier_forward_pallas(img_labels, logits, w_comb, b_comb, *, row_block=4096):
    # Output is provably independent of img_labels (softmax over identical
    # rows is uniform); PyTorch only needs img_labels.max()+1 == n_features.
    del img_labels
    N, E = logits.shape
    C = w_comb.shape[-1]
    if w_comb.dtype != logits.dtype:
        w_comb = w_comb.astype(logits.dtype)  # tiny (E, C); keep both MXU inputs same dtype

    # row_block is a multiple of 8; ragged trailing block is masked by Pallas,
    # so there is never a giant tn=N fallback block for large, odd N.
    tn = min(row_block, N)
    grid = (pl.cdiv(N, tn),)

    return pl.pallas_call(
        _classifier_kernel,
        out_shape=jax.ShapeDtypeStruct((N, C), jnp.float32),
        grid=grid,
        in_specs=[
            pl.BlockSpec((tn, E), lambda i: (i, 0)),     # logits row tile (bf16)
            pl.BlockSpec((E, C), lambda i: (0, 0)),      # folded weight (resident)
            pl.BlockSpec((1, C), lambda i: (0, 0)),      # folded bias   (resident)
        ],
        out_specs=pl.BlockSpec((tn, C), lambda i: (i, 0)),
        compiler_params=pltpu.CompilerParams(
            # "parallel" lets the grid shard across v7x's 2 TensorCores.
            dimension_semantics=("parallel",),
            # Sized against the lane-padded (tn,128) VMEM layout, double
            # buffered: ~6 MiB at tn=4096 — comfortable headroom even under
            # v7x's 64 MiB physical / 32 MiB scoped VMEM.
            vmem_limit_bytes=32 * 1024 * 1024,
        ),
    )(logits, w_comb, b_comb)


def classifier_forward(img_labels, logits, w_comb, b_comb, *,
                       row_block=4096, min_pallas_rows=2048):
    """Recommended entry point: fused jnp for tiny N, Pallas kernel for large N."""
    if logits.shape[0] < min_pallas_rows:
        x = logits.astype(w_comb.dtype)
        return jnp.dot(x, w_comb, preferred_element_type=jnp.float32) + b_comb
    return classifier_forward_pallas(img_labels, logits, w_comb, b_comb,
                                     row_block=row_block)


# ---------------------------------------------------------------------------
# Full-math plain-JAX reference (one-hot keys, Q/K projections, softmax) used
# to validate that the folded kernel matches the original module's math.
# ---------------------------------------------------------------------------
def classifier_forward_ref(img_labels, logits, params):
    N, E = logits.shape
    B = N
    keys = jax.nn.one_hot(img_labels, E, dtype=jnp.float32)           # (N, E)
    wq, wk, wv = jnp.split(params["in_proj_w"], 3, axis=0)
    bq, bk, bv = jnp.split(params["in_proj_b"], 3, axis=0)
    wo, bo = params["out_proj_w"], params["out_proj_b"]
    wfc, bfc = params["fc_w"], params["fc_b"]

    def one(key_row, val_row):
        kb = jnp.broadcast_to(key_row[None], (B, E))   # B identical q/k rows
        vb = jnp.broadcast_to(val_row[None], (B, E))   # B identical value rows
        q = kb @ wq.T + bq
        k = kb @ wk.T + bk
        v = vb @ wv.T + bv
        a = jax.nn.softmax((q / math.sqrt(E)) @ k.T, axis=-1)         # (B, B)
        o = (a @ v) @ wo.T + bo
        return o[0] @ wfc.T + bfc

    return jax.vmap(one)(keys, logits)


def init_params(key, n_classes, n_features):
    E = n_features
    k1, k2, k3, k4, k5, k6 = jax.random.split(key, 6)
    return dict(
        in_proj_w=(jax.random.normal(k1, (3 * E, E), jnp.float32) / math.sqrt(E)),
        in_proj_b=(0.01 * jax.random.normal(k2, (3 * E,), jnp.float32)),
        out_proj_w=(jax.random.normal(k3, (E, E), jnp.float32) / math.sqrt(E)),
        out_proj_b=(0.01 * jax.random.normal(k4, (E,), jnp.float32)),
        fc_w=(jax.random.normal(k5, (n_classes, E), jnp.float32) / math.sqrt(E)),
        fc_b=(0.01 * jax.random.normal(k6, (n_classes,), jnp.float32)),
    )


if __name__ == "__main__":
    n_features = 32
    n_classes = 8

    key = jax.random.PRNGKey(0)
    kp, kl, kg, kg2 = jax.random.split(key, 4)
    params = init_params(kp, n_classes, n_features)

    # Fold the weights once (hoisted out of the per-forward path).
    w_f32, b_comb = fold_params(params, compute_dtype=jnp.float32)
    w_bf16, _ = fold_params(params, compute_dtype=jnp.bfloat16)

    # ---- small shape matching the module's intended usage --------------------
    N = 8
    img_labels = jax.random.randint(kl, (N,), 0, n_features, dtype=jnp.int32)
    img_labels = img_labels.at[-1].set(n_features - 1)  # eye(max+1) width == n_features
    logits = jax.random.normal(kg, (N, n_features), jnp.float32)
    logits_bf = logits.astype(jnp.bfloat16)             # bf16 activation path

    out = classifier_forward_pallas(img_labels, logits_bf, w_bf16, b_comb)
    jax.block_until_ready(out)
    assert out.shape == (N, n_classes) and out.dtype == jnp.float32

    # (A) the algebraic collapse/fold matches the full attention math (f32, tight)
    ref_full = classifier_forward_ref(img_labels, logits, params)
    collapsed_f32 = logits @ w_f32 + b_comb
    assert jnp.allclose(collapsed_f32, ref_full, atol=1e-4, rtol=1e-4), \
        "fold mismatch vs full-math reference"
    # (B) the Pallas kernel matches the identical bf16-in / f32-acc jnp math (tight)
    ref_bf = jnp.dot(logits_bf, w_bf16, preferred_element_type=jnp.float32) + b_comb
    assert jnp.allclose(out, ref_bf, atol=1e-3, rtol=1e-3), "kernel mismatch vs jnp"
    # (C) end-to-end vs full-math reference, loose bf16 tolerance
    assert jnp.allclose(out, ref_full, atol=1e-1, rtol=1e-1), "end-to-end drift too large"

    # ---- multi-block grid + ragged trailing block (remainder path) -----------
    N2 = 2050  # not a multiple of the tile -> exercises Pallas partial-block masking
    logits2 = jax.random.normal(kg2, (N2, n_features), jnp.bfloat16)
    labels2 = jnp.zeros((N2,), jnp.int32)
    out2 = classifier_forward_pallas(labels2, logits2, w_bf16, b_comb, row_block=1024)
    jax.block_until_ready(out2)
    ref2 = jnp.dot(logits2, w_bf16, preferred_element_type=jnp.float32) + b_comb
    assert out2.shape == (N2, n_classes)
    assert jnp.allclose(out2, ref2, atol=1e-3, rtol=1e-3), "remainder-path mismatch"

    print("KERNEL_OK")
</pallas_src>

<mosaic_0001>
module attributes {stable_mosaic.version = 11 : i64} {
  func.func @_classifier_kernel(%arg0: i32, %arg1: memref<8x32xbf16, #tpu.memory_space<vmem>>, %arg2: memref<32x8xbf16, #tpu.memory_space<vmem>>, %arg3: memref<1x8xf32, #tpu.memory_space<vmem>>, %arg4: memref<8x8xf32, #tpu.memory_space<vmem>>) attributes {dimension_semantics = [#tpu.dimension_semantics<parallel>], iteration_bounds = array<i64: 1>, scalar_prefetch = 0 : i64, scratch_operands = 0 : i64, tpu.core_type = #tpu.core_type<tc>, window_params = [{transform_indices = @transform_0, window_bounds = array<i64: 8, 32>}, {pipeline_mode = #tpu.pipeline_mode<synchronous>, transform_indices = @transform_1, window_bounds = array<i64: 32, 8>}, {pipeline_mode = #tpu.pipeline_mode<synchronous>, transform_indices = @transform_2, window_bounds = array<i64: 1, 8>}, {transform_indices = @transform_3, window_bounds = array<i64: 8, 8>}]} {
    %c0 = arith.constant 0 : index
    %c0_0 = arith.constant 0 : index
    %0 = vector.load %arg1[%c0, %c0_0] : memref<8x32xbf16, #tpu.memory_space<vmem>>, vector<8x32xbf16>
    %c0_1 = arith.constant 0 : index
    %c0_2 = arith.constant 0 : index
    %1 = vector.load %arg2[%c0_1, %c0_2] : memref<32x8xbf16, #tpu.memory_space<vmem>>, vector<32x8xbf16>
    %cst = arith.constant dense<0.000000e+00> : vector<8x8xf32>
    %2 = tpu.matmul %0, %1, %cst {dimension_numbers = #tpu.dot_dimension_numbers<[1], [0], [0], [1], [0, 0, 1, 1], [], []>} : vector<8x32xbf16>, vector<32x8xbf16>, vector<8x8xf32> -> vector<8x8xf32>
    %c0_3 = arith.constant 0 : index
    %c0_4 = arith.constant 0 : index
    %3 = vector.load %arg3[%c0_3, %c0_4] : memref<1x8xf32, #tpu.memory_space<vmem>>, vector<1x8xf32>
    %4 = vector.broadcast %3 : vector<1x8xf32> to vector<8x8xf32>
    %5 = arith.addf %2, %4 : vector<8x8xf32>
    %c0_5 = arith.constant 0 : index
    %c0_6 = arith.constant 0 : index
    %6 = vector.load %arg4[%c0_5, %c0_6] : memref<8x8xf32, #tpu.memory_space<vmem>>, vector<8x8xf32>
    tpu.vector_store %arg4[%c0_5, %c0_6], %5 {strides = array<i32>} : memref<8x8xf32, #tpu.memory_space<vmem>>, vector<8x8xf32>,
    return
  }
  func.func @transform_0(%arg0: i32) -> (i32, i32) {
    %c0_i32 = arith.constant 0 : i32
    %c0_i32_0 = arith.constant 0 : i32
    return %arg0, %c0_i32 : i32, i32
  }
  func.func @transform_1(%arg0: i32) -> (i32, i32) {
    %c0_i32 = arith.constant 0 : i32
    %c0_i32_0 = arith.constant 0 : i32
    %c0_i32_1 = arith.constant 0 : i32
    return %c0_i32, %c0_i32_0 : i32, i32
  }
  func.func @transform_2(%arg0: i32) -> (i32, i32) {
    %c0_i32 = arith.constant 0 : i32
    %c0_i32_0 = arith.constant 0 : i32
    %c0_i32_1 = arith.constant 0 : i32
    return %c0_i32, %c0_i32_0 : i32, i32
  }
  func.func @transform_3(%arg0: i32) -> (i32, i32) {
    %c0_i32 = arith.constant 0 : i32
    %c0_i32_0 = arith.constant 0 : i32
    return %arg0, %c0_i32 : i32, i32
  }
}

</mosaic_0001>

<bundles_post_ra>
// kernel: tpu_custom_call.1
= control target key start
LH: loop header
LB: loop body
LE: loop exit
PB: predicated region body
PF: predicated region fallthrough
CT: control target
= control target key end

     0   :  { %v144_v1 = vmov 0.0   ;;  %vm145_vm0 = vmmov 0   ;;  %s191_s0 = inlined_call_operand.vmem [shape: bf16[8,32], index: 0, kind: input, shape index: {}]   ;;  %s192_s1 = inlined_call_operand.vmem [shape: bf16[32,8], index: 1, kind: input, shape index: {}]   ;;  %s193_s2 = inlined_call_operand.vmem [shape: f32[1,8], index: 2, kind: input, shape index: {}]   ;;  %s194_s3 = inlined_call_operand.hbm [shape: f32[8,8], index: 3, kind: output, shape index: {}]  }
   0x1   :  { %v118_v0 = vld [vmem:[%s192_s1] sm:$0xff]   ;;  %107 = vmatprep.subr.bf16.mxu0 %v144_v1  ;;  %v119_v2 = vld [vmem:[%s192_s1 + $0x8] sm:$0xff]   ;;  %111 = vmatprep.mubr.msk.bf16.mxu0 %vm145_vm0, %v144_v1 }
   0x2   :  { %108 = vmatpush3.bf16.msra.mxu0 %v118_v0 }
   0x3   :  { %109 = vmatprep.subr.bf16.mxu0 %v144_v1 }
   0x4   :  { %8 = vsyncpa [#allocation3], 0  ;;  %v16_v3 = vld [vmem:[%s191_s0] sm:$0xf]  ;;  %vm40_vm1 = vcmask 261120   ;;  %s146_s20 = smov [#allocation2]  }
   0x5   :  { %v100_v4 = vld [vmem:[%s193_s2] ss:$0 sm:$0xff]  ;;  %s92_s21 = sshll.u32 %s146_s20, 4  ;;  %vm84_vm2 = vcmask 64512   ;;  %s93_s21 = int_to_ptr.vmem [resolvable:$true] %s92_s21 }
   0x6   :  { %110 = vmatpush3.bf16.msra.mxu0 %v119_v2  ;;  %s120_s1 = scalar_lea.vmem %s93_s21, 128  ;;  %p125_p1 = scmp.lt.s32.totalorder %s93_s21, %s93_s21 }
   0x7   :  { %p121_p0 = scmp.ne.s32.totalorder %s93_s21, %s120_s1  ;;  %p126_p2 = scmp.lt.s32.totalorder %s120_s1, %s120_s1 }
   0x9   :  { %112 = vmatmul.mubr.msk.bf16.vlgmr.msra.gmra.mrb[0].mxu0 %vm40_vm1, %v16_v3  ;;  %p127_p3 = por %p126_p2, %p125_p1 }
   0xb   :  { %p128_p4 = pnand %p127_p3, %p121_p0 }
  0xdc   :  { %v78_v5 = vpop.f32.mrb[0].mxu0 }
  0xdd   :  { %v79_v6 = vadd.f32 %v100_v4, %v78_v5  ;;  %v113_v7 = vpop.f32.mrb[1].mxu0 }
  0xde   :  { %v81_v8 = vpop.f32.mrb[2].mxu0 }
  0xdf   :  { %v114_v9 = vpop.f32.mrb[3].mxu0  ;;  %85 = vst.msk [vmem:[#allocation2] sm:$0xff] %vm84_vm2, %v79_v6 }
  0xe0   :  { %131 = shalt.err (!%p128_p4)
}
  0xe1   :  { %s132_s2 = scalar_lea.hbm %s194_s3, 128 }
  0xe2   :  { %p133_p5 = scmp.ne.s32.totalorder %s194_s3, %s132_s2  ;;  %p136_p6 = scmp.lt.u32.totalorder %s132_s2, %s194_s3 }
  0xe4   :  { %p138_p7 = pnand %p136_p6, %p133_p5 }
  0xe6   :  { %141 = shalt.err (!%p138_p7)
}
  0xe7   :  { %95 = dma.vmem_to_hbm [thread:$0]  %s93_s21, 128, %s194_s3, [#allocation3]  }
  0xe8   :  { %142 = dma.done.wait [#allocation3], 128  }
  0xe9   :  { %143 = vsyncadd [#allocation3], 4294967168 }
  0xea   :  { %99 = vsyncpa [#allocation3], 1 }

</bundles_post_ra>
